<compile_context>
chip_gen: v7x
topology: tpu7x:2x2x1
jax: 0.10.0
libtpu: 0.0.40
codegen_flags: <defaults>
</compile_context>

<pallas_src>
import functools

import jax
import jax.numpy as jnp
from jax.experimental import pallas as pl
from jax.experimental.pallas import tpu as pltpu

EPS = 1e-5  # nn.InstanceNorm1d default


def adain1d_kernel(x_ref, gb_ref, o_ref, *, inv_t):
    # x_ref: (1, TC, T)   gb_ref: (1, TC, 2) with [...,0]=1+gamma, [...,1]=beta
    # o_ref: (1, TC, T)
    x = x_ref[...].astype(jnp.float32)

    # Two-pass statistics over T (numerically stable; both sweeps are VMEM-only).
    mean = jnp.sum(x, axis=-1, keepdims=True) * inv_t            # (1, TC, 1)
    d = x - mean
    var = jnp.sum(d * d, axis=-1, keepdims=True) * inv_t         # biased variance

    gb = gb_ref[...].astype(jnp.float32)                          # (1, TC, 2)
    scale = gb[:, :, 0:1] * jax.lax.rsqrt(var + EPS)              # (1+gamma)/std
    # Fused epilogue: out = (x - mean) * scale + beta.
    o_ref[...] = (d * scale + gb[:, :, 1:2]).astype(o_ref.dtype)


def _sublane_align(dtype):
    """Sublane alignment for the channel tile, per packed-vreg layout."""
    itemsize = jnp.dtype(dtype).itemsize
    return {4: 8, 2: 16, 1: 32}.get(itemsize, 8)


def _vmem_budget():
    """(per-input-tile target bytes, vmem_limit_bytes), generation-aware."""
    vmem = None
    try:
        vmem = getattr(pltpu.get_tpu_info(), "vmem_capacity_bytes", None)
    except Exception:
        vmem = None
    if vmem is not None and vmem >= 96 * 1024 * 1024:
        # v5e / v6e: 128 MiB physical VMEM -> bigger tiles, longer DMAs.
        return 16 * 1024 * 1024, 96 * 1024 * 1024
    # v7x (64 MiB per TensorCore) or unknown: stay conservative.
    # 2x(in) + 2x(out) tiles at 8 MiB = 32 MiB, well under the 40 MiB limit.
    return 8 * 1024 * 1024, 40 * 1024 * 1024


def _pick_c_tile(C, T, itemsize, *, target_bytes, align, min_c_blocks=1):
    """Channel tile TC: either a multiple of `align` (< C) or exactly C."""
    row_bytes = max(1, T * itemsize)
    max_tc = max(align, (target_bytes // row_bytes) // align * align)
    if min_c_blocks > 1:
        # Cap TC so there are at least `min_c_blocks` channel blocks (megacore).
        cap = max(align, (pl.cdiv(C, min_c_blocks) // align) * align)
        if cap < C:
            max_tc = min(max_tc, cap)
    if max_tc >= C:
        return C  # single full-C block (block dim == full dim is always legal)
    return max_tc  # align-multiple < C; grid uses cdiv -> partial edge tile OK
    # TODO(synk): pathological shapes where even an `align`-row tile exceeds the
    # VMEM budget (huge T) would need a T-axis grid with scratch accumulators.


def adain1d(x, s, w, b):
    """x: (B, C, T), s: (B, S), w: (2C, S), b: (2C,) -> (B, C, T)."""
    B, C, T = x.shape

    # --- Style Linear hoisted to a single batched XLA matmul ----------------
    h = (s.astype(jnp.float32) @ w.astype(jnp.float32).T
         + b.astype(jnp.float32))                                 # (B, 2C)
    gb = jnp.stack([1.0 + h[:, :C], h[:, C:]], axis=-1)           # (B, C, 2) f32

    itemsize = jnp.dtype(x.dtype).itemsize
    align = _sublane_align(x.dtype)
    target_bytes, vmem_limit = _vmem_budget()
    min_c_blocks = 2 if B == 1 else 1  # keep both v7x TensorCores busy
    TC = _pick_c_tile(C, T, itemsize, target_bytes=target_bytes,
                      align=align, min_c_blocks=min_c_blocks)

    grid = (B, pl.cdiv(C, TC))  # TC need not divide C; edge tile is partial
    kernel = functools.partial(adain1d_kernel, inv_t=1.0 / T)

    cost = pl.CostEstimate(
        flops=7 * B * C * T,
        transcendentals=B * C,
        bytes_accessed=2 * B * C * T * itemsize + gb.size * 4,
    )

    return pl.pallas_call(
        kernel,
        out_shape=jax.ShapeDtypeStruct((B, C, T), x.dtype),
        grid_spec=pltpu.PrefetchScalarGridSpec(
            num_scalar_prefetch=0,
            grid=grid,
            in_specs=[
                pl.BlockSpec((1, TC, T), lambda bi, ci: (bi, ci, 0)),  # x tile
                pl.BlockSpec((1, TC, 2), lambda bi, ci: (bi, ci, 0)),  # (1+g, beta)
            ],
            out_specs=pl.BlockSpec((1, TC, T), lambda bi, ci: (bi, ci, 0)),
        ),
        compiler_params=pltpu.CompilerParams(
            dimension_semantics=("parallel", "parallel"),
            vmem_limit_bytes=vmem_limit,
        ),
        cost_estimate=cost,
    )(x, gb)


def adain1d_ref(x, s, w, b):
    """Pure-JAX reference identical to the PyTorch forward (f32 math)."""
    h = s.astype(jnp.float32) @ w.astype(jnp.float32).T + b.astype(jnp.float32)
    C = x.shape[1]
    gamma, beta = h[:, :C], h[:, C:]
    xf = x.astype(jnp.float32)
    mean = jnp.mean(xf, axis=-1, keepdims=True)
    var = jnp.mean((xf - mean) ** 2, axis=-1, keepdims=True)
    xn = (xf - mean) / jnp.sqrt(var + EPS)
    return (1.0 + gamma)[:, :, None] * xn + beta[:, :, None]


def _run_case(key, B, C, T, STYLE, dtype=jnp.float32, offset=0.0,
              atol=1e-4, rtol=1e-4):
    kx, ks, kw, kb = jax.random.split(key, 4)
    x = (jax.random.normal(kx, (B, C, T), dtype=jnp.float32) + offset).astype(dtype)
    s = jax.random.normal(ks, (B, STYLE), dtype=jnp.float32)
    bound = 1.0 / (STYLE ** 0.5)
    w = jax.random.uniform(kw, (2 * C, STYLE), minval=-bound, maxval=bound,
                           dtype=jnp.float32)
    b = jax.random.uniform(kb, (2 * C,), minval=-bound, maxval=bound,
                           dtype=jnp.float32)

    out = adain1d(x, s, w, b)
    jax.block_until_ready(out)

    ref = adain1d_ref(x, s, w, b)
    assert out.shape == (B, C, T)
    assert jnp.allclose(out.astype(jnp.float32), ref, atol=atol, rtol=rtol), \
        f"mismatch vs reference for shape {(B, C, T)}, dtype={jnp.dtype(dtype)}"


if __name__ == "__main__":
    key = jax.random.PRNGKey(0)
    keys = jax.random.split(key, 5)

    # Lane-aligned T, single full-C block.
    _run_case(keys[0], B=2, C=8, T=128, STYLE=32)
    # Ragged T (no wrapper pad/slice; kernel block covers the full T=96).
    _run_case(keys[1], B=2, C=16, T=96, STYLE=32)
    # Non-zero-mean activations: exercises the two-pass (stable) variance path.
    _run_case(keys[2], B=2, C=16, T=96, STYLE=32, offset=100.0,
              atol=1e-3, rtol=1e-3)
    # B=1: channel axis is split (both v7x cores get work) and C % TC != 0
    # exercises the partial edge channel tile.
    _run_case(keys[3], B=1, C=40, T=192, STYLE=32)
    # bf16 activations: dtype-aware (16-row) sublane alignment, bf16 in/out.
    _run_case(keys[4], B=2, C=32, T=160, STYLE=32, dtype=jnp.bfloat16,
              atol=5e-2, rtol=5e-2)

    print("KERNEL_OK")
</pallas_src>

<mosaic_0001>
module attributes {stable_mosaic.version = 11 : i64} {
  func.func @adain1d_kernel(%arg0: i32, %arg1: i32, %arg2: memref<1x8x128xf32, #tpu.memory_space<vmem>>, %arg3: memref<1x8x2xf32, #tpu.memory_space<vmem>>, %arg4: memref<1x8x128xf32, #tpu.memory_space<vmem>>) attributes {dimension_semantics = [#tpu.dimension_semantics<parallel>, #tpu.dimension_semantics<parallel>], iteration_bounds = array<i64: 2, 1>, scalar_prefetch = 0 : i64, scratch_operands = 0 : i64, tpu.core_type = #tpu.core_type<tc>, window_params = [{transform_indices = @transform_0, window_bounds = array<i64: 1, 8, 128>}, {transform_indices = @transform_1, window_bounds = array<i64: 1, 8, 2>}, {transform_indices = @transform_2, window_bounds = array<i64: 1, 8, 128>}]} {
    %c0 = arith.constant 0 : index
    %c0_0 = arith.constant 0 : index
    %c0_1 = arith.constant 0 : index
    %0 = vector.load %arg2[%c0, %c0_0, %c0_1] : memref<1x8x128xf32, #tpu.memory_space<vmem>>, vector<1x8x128xf32>
    %cst = arith.constant dense<0.000000e+00> : vector<1x8xf32>
    %1 = vector.multi_reduction <add>, %0, %cst [2] : vector<1x8x128xf32> to vector<1x8xf32>
    %2 = vector.shape_cast %1 : vector<1x8xf32> to vector<1x8x1xf32>
    %cst_2 = arith.constant 7.812500e-03 : f32
    %3 = vector.broadcast %cst_2 : f32 to vector<1x8x1xf32>
    %4 = arith.mulf %2, %3 : vector<1x8x1xf32>
    %5 = vector.broadcast %4 : vector<1x8x1xf32> to vector<1x8x128xf32>
    %6 = arith.subf %0, %5 : vector<1x8x128xf32>
    %7 = arith.mulf %6, %6 : vector<1x8x128xf32>
    %cst_3 = arith.constant dense<0.000000e+00> : vector<1x8xf32>
    %8 = vector.multi_reduction <add>, %7, %cst_3 [2] : vector<1x8x128xf32> to vector<1x8xf32>
    %9 = vector.shape_cast %8 : vector<1x8xf32> to vector<1x8x1xf32>
    %cst_4 = arith.constant 7.812500e-03 : f32
    %10 = vector.broadcast %cst_4 : f32 to vector<1x8x1xf32>
    %11 = arith.mulf %9, %10 : vector<1x8x1xf32>
    %c0_5 = arith.constant 0 : index
    %c0_6 = arith.constant 0 : index
    %c0_7 = arith.constant 0 : index
    %12 = vector.load %arg3[%c0_5, %c0_6, %c0_7] : memref<1x8x2xf32, #tpu.memory_space<vmem>>, vector<1x8x2xf32>
    %13 = vector.extract_strided_slice %12 {offsets = [0, 0, 0], sizes = [1, 8, 1], strides = [1, 1, 1]} : vector<1x8x2xf32> to vector<1x8x1xf32>
    %cst_8 = arith.constant 9.99999974E-6 : f32
    %14 = vector.broadcast %cst_8 : f32 to vector<1x8x1xf32>
    %15 = arith.addf %11, %14 : vector<1x8x1xf32>
    %16 = math.rsqrt %15 : vector<1x8x1xf32>
    %17 = arith.mulf %13, %16 : vector<1x8x1xf32>
    %18 = vector.broadcast %17 : vector<1x8x1xf32> to vector<1x8x128xf32>
    %19 = arith.mulf %6, %18 : vector<1x8x128xf32>
    %20 = vector.extract_strided_slice %12 {offsets = [0, 0, 1], sizes = [1, 8, 1], strides = [1, 1, 1]} : vector<1x8x2xf32> to vector<1x8x1xf32>
    %21 = vector.broadcast %20 : vector<1x8x1xf32> to vector<1x8x128xf32>
    %22 = arith.addf %19, %21 : vector<1x8x128xf32>
    %c0_9 = arith.constant 0 : index
    %c0_10 = arith.constant 0 : index
    %c0_11 = arith.constant 0 : index
    %23 = vector.load %arg4[%c0_9, %c0_10, %c0_11] : memref<1x8x128xf32, #tpu.memory_space<vmem>>, vector<1x8x128xf32>
    tpu.vector_store %arg4[%c0_9, %c0_10, %c0_11], %22 {strides = array<i32>} : memref<1x8x128xf32, #tpu.memory_space<vmem>>, vector<1x8x128xf32>,
    return
  }
  func.func @transform_0(%arg0: i32, %arg1: i32) -> (i32, i32, i32) {
    %c0_i32 = arith.constant 0 : i32
    %c0_i32_0 = arith.constant 0 : i32
    return %arg0, %arg1, %c0_i32 : i32, i32, i32
  }
  func.func @transform_1(%arg0: i32, %arg1: i32) -> (i32, i32, i32) {
    %c0_i32 = arith.constant 0 : i32
    %c0_i32_0 = arith.constant 0 : i32
    return %arg0, %arg1, %c0_i32 : i32, i32, i32
  }
  func.func @transform_2(%arg0: i32, %arg1: i32) -> (i32, i32, i32) {
    %c0_i32 = arith.constant 0 : i32
    %c0_i32_0 = arith.constant 0 : i32
    return %arg0, %arg1, %c0_i32 : i32, i32, i32
  }
}

</mosaic_0001>

<bundles_post_ra>
// kernel: tpu_custom_call.1
= control target key start
LH: loop header
LB: loop body
LE: loop exit
PB: predicated region body
PF: predicated region fallthrough
CT: control target
= control target key end

     0   :  { %7 = vsyncpa [#allocation3], 0  ;;  %s606_s0 = inlined_call_operand.vmem [shape: f32[2,8,128], index: 0, kind: input, shape index: {}]   ;;  %s607_s1 = inlined_call_operand.vmem [shape: f32[2,8,2], index: 1, kind: input, shape index: {}]   ;;  %s608_s2 = inlined_call_operand.hbm [shape: f32[2,8,128], index: 2, kind: output, shape index: {}]  }
   0x1   :  { %9 = vsyncpa [#allocation3 + $0x1], 0  ;;  %s491_s9 = smov 0   ;;  %s493_s10 = smov 0  }
   0x2   :  { %s495_s11 = smov 0   ;;  %s497_s12 = smov 0  }
   0x3   :  { %s499_s13 = smov 0   ;;  %s501_s14 = smov 0  }
   0x4 LB: > { %s319_s15 = sadd.s32 4294967295, %s471_s14   ;;  %s320_s16 = sadd.s32 4294967294, %s471_s14   ;;  %s471_s14 = sphi %s501_s14, %s15_s14   ;;  %s467_s13 = sphi %s499_s13, %s615_s13   ;;  %s463_s12 = sphi %s497_s12, %s614_s12   ;;  %s459_s11 = sphi %s495_s11, %s613_s11   ;;  %s455_s10 = sphi %s493_s10, %s612_s10   ;;  %s451_s9 = sphi %s491_s9, %s611_s9  }
   0x5   : > { %s27_s17 = sadd.s32 1, %s467_s13  ;;  %s92_s18 = sadd.s32 1, %s459_s11 }
   0x6   : > { %p29_p0 = scmp.ge.s32.totalorder %s27_s17, 2  ;;  %p102_p1 = scmp.ne.s32.totalorder %s459_s11, %s455_s10 }
   0x7   : > { %p103_p2 = scmp.eq.s32.totalorder %s319_s15, 1  ;;  %p108_p3 = scmp.ne.s32.totalorder %s455_s10, %s451_s9 }
   0x8   : > { %s617_s17 = smov (%p29_p0, %s27_s17), 0  ;;  %p109_p5 = scmp.eq.s32.totalorder %s320_s16, 1 }
   0x9   : > { %p531_p4 = por %p103_p2, %p102_p1  ;;  %s87_s20 = ssub.s32 %s467_s13, %s617_s17 }
   0xa   : > { %p323_p6 = scmp.ge.s32.totalorder %s471_s14, 1  ;;  %p90_p7 = scmp.eq.s32.totalorder %s87_s20, 0 }
   0xb   : > { %p538_p8 = por %p109_p5, %p108_p3  ;;  %p147_p9 = scmp.lt.s32.totalorder %s471_s14, 3 }
   0xc   : > { %s544_s22 = scalar_select %p90_p7, %s459_s11, %s92_s18  }
   0xd   : > { %p148_p10 = pnand %p323_p6, %p147_p9 }
   0xe   : > { %p178_p11 = scmp.lt.s32.totalorder (!%p148_p10), %s463_s12, 1  ;;  %v473_v5 = vmov (!%p148_p10), 0   ;;  %v474_v6 = vmov (!%p148_p10), 1   ;;  %s175_s3 = sand.u32 (!%p148_p10), 1, %s455_s10  }
   0xf   : > { %151 = sbr.rel (%p148_p10) target bundleno = 483 (0x1e3), region = 28  ;;  %388 = vset.pattern.permute.xlu1 (!%p148_p10), %v473_v5  ;;  %390 = vset.pattern.permute.xlu0 (!%p148_p10), %v474_v6  ;;  %s324_s4 = sshll.u32 (!%p148_p10), %s175_s3, 3 }
  0x10   : > { %s328_s5 = sshll.u32 (!%p148_p10), %s463_s12, 7  ;;  %s177_s6 = scalar_lea.vmem (!%p148_p10), [#allocation2], %s324_s4 }
  0x11   : > { %s233_s7 = sshll.u32 (!%p148_p10), %s177_s6, 4  ;;  %s559_s16 = scalar_lea.hbm (!%p148_p10), %s608_s2, %s328_s5  ;;  %s561_s7 = int_to_ptr.vmem [resolvable:$true] %s233_s7 }
  0x12   : > { %s219_s18 = scalar_lea.sflag (!%p148_p10), [#allocation3], %s175_s3  ;;  %s393_s20 = scalar_lea.vmem (!%p148_p10), %s561_s7, 128 }
  0x13   : > { %p394_p12 = scmp.ne.s32.totalorder (!%p148_p10), %s561_s7, %s393_s20 }
  0x15   : > { %p395_p13 = pnand (!%p148_p10), %p394_p12, %p531_p4 }
  0x16   : > { %s179_s23 = scalar_select %p178_p11, %s463_s12, 1 }
  0x17   : > { %p396_p0 = pneg %p395_p13  ;;  %s475_s12 = smov [#allocation2]  }
  0x18   : > { %s325_s24 = sshll.u32 %s179_s23, 3  ;;  %s397_s23 = sshll.u32 %s475_s12, 4  ;;  %s398_s23 = int_to_ptr.vmem [resolvable:$false] %s397_s23 }
  0x19   : > { %s184_s27 = scalar_lea.vmem %s606_s0, %s325_s24  ;;  %s191_s30 = scalar_lea.vmem %s607_s1, %s325_s24 }
  0x1a   : > { %v192_v0 = vld [vmem:[%s184_s27] sm:$0xff]  ;;  %s399_s24 = scalar_lea.vmem %s398_s23, 256  ;;  %p400_p1 = scmp.lt.s32.totalorder %s561_s7, %s398_s23 }
  0x1b   : > { %193 = vadd.xlane.f32.xlu0 %v192_v0  ;;  %v201_v10 = vld [vmem:[%s191_s30] sm:$0xff]  ;;  %p401_p2 = scmp.lt.s32.totalorder %s399_s24, %s393_s20 }
  0x1d   : > { %p402_p3 = por %p401_p2, %p400_p1 }
  0x1f   : > { %p403_p5 = pnand %p402_p3, %p396_p0 }
  0xa8   : > { %v194_v1 = vpop.xlane.xlu0 %193 }
  0xa9   : > { %v195_v2 = vmul.f32 0.0078125, %v194_v1 }
  0xab   : > { %v196_v3 = vsub.f32 %v192_v0, %v195_v2 }
  0xad   : > { %v197_v4 = vmul.f32 %v196_v3, %v196_v3 }
  0xaf   : > { %198 = vadd.xlane.f32.xlu0 %v197_v4 }
 0x13c   : > { %v199_v7 = vpop.xlane.xlu0 %198 }
 0x13d   : > { %v200_v8 = vmul.f32 0.0078125, %v199_v7 }
 0x13f   : > { %v202_v9 = vadd.f32 1e-05, %v200_v8 }
 0x141   : > { %391 = vrsqrt.f32 %v202_v9 }
 0x14b   : > { %v392_v11 = vpop.eup %391 }
 0x14c   : > { %v204_v12 = vmul.f32 %v392_v11, %v201_v10 }
 0x14e   : > { %207 = vperm.xlu1 %388, %v204_v12  }
 0x152   : > { %389 = vset.pattern.permute.xlu1 %v474_v6 }
 0x153   : > { %213 = vperm.xlu1 %389, %v201_v10  }
 0x1cd   : > { %v208_v13 = vpop.permute.xlu1 %207 }
 0x1ce   : > { %v210_v14 = vmul.f32 %v208_v13, %v196_v3 }
 0x1d2   : > { %v214_v15 = vpop.permute.xlu1 %213 }
 0x1d3   : > { %v216_v16 = vadd.f32 %v214_v15, %v210_v14 }
 0x1d5   : > { %217 = vst [vmem:[%s177_s6] sm:$0xff] %v216_v16 }
 0x1d6   : > { %406 = shalt.err (!%p403_p5)
}
 0x1d7   : > { %s407_s25 = scalar_lea.hbm %s559_s16, 128  ;;  %s411_s28 = scalar_lea.hbm %s608_s2, 256 }
 0x1d8   : > { %p408_p6 = scmp.ne.s32.totalorder %s559_s16, %s407_s25  ;;  %p412_p10 = scmp.lt.u32.totalorder %s559_s16, %s608_s2 }
 0x1d9   : > { %p413_p11 = scmp.lt.u32.totalorder %s411_s28, %s407_s25  ;;  %p415_p13 = scmp.lt.u32.totalorder %s407_s25, %s559_s16 }
 0x1da   : > { %p409_p7 = pnand %p408_p6, %p531_p4 }
 0x1db   : > { %p414_p12 = por %p413_p11, %p412_p10 }
 0x1dc   : > { %p410_p9 = pneg %p409_p7 }
 0x1dd   : > { %p416_p0 = por %p415_p13, %p414_p12 }
 0x1df   : > { %p417_p1 = pnand %p416_p0, %p410_p9 }
 0x1e1   : > { %420 = shalt.err (!%p417_p1)
}
 0x1e2   : > { %331 = dma.vmem_to_hbm [thread:$0]  (%p531_p4), %s561_s7, 128, %s559_s16, %s219_s18  }
 0x1e3 PF: > { %p337_p2 = scmp.ge.s32.totalorder %s471_s14, 2  ;;  %s245_s3 = sand.u32 1, %s451_s9  }
 0x1e4   : > { %s246_s4 = scalar_lea.sflag [#allocation3], %s245_s3 }
 0x1e5   : > { %p334_p3 = pnand %p337_p2, %p538_p8 }
 0x1e7   : > { %446 = dma.done.wait (!%p334_p3), %s246_s4, 128  }
 0x1e8   : > { %448 = vsyncadd (!%p334_p3), %s246_s4, 4294967168  ;;  %s15_s14 = sadd.s32 1, %s471_s14   ;;  %s611_s9 = smov %s455_s10 }
 0x1e9   : > { %p12_p5 = scmp.ge.s32.totalorder %s15_s14, 4   ;;  %s612_s10 = smov %s459_s11 }
 0x1ea   : > { %s613_s11 = smov %s544_s22  ;;  %s614_s12 = smov %s467_s13 }
 0x1eb   : > { %s615_s13 = smov %s617_s17  ;;  %14 = sbr.rel (!%p12_p5) target bundleno = 4 (0x4), region = 66 }
 0x1f2   :  { %251 = vsyncpa [#allocation3], 1 }
 0x1f3   :  { %253 = vsyncpa [#allocation3 + $0x1], 1 }

</bundles_post_ra>
